<compile_context>
chip_gen: v6e
topology: v6e:2x2x1
jax: 0.10.0
libtpu: 0.0.40
codegen_flags: <defaults>
</compile_context>

<pallas_src>
import jax
import jax.numpy as jnp
from jax.experimental import pallas as pl
from jax.experimental.pallas import tpu as pltpu


def _round_up(v: int, m: int) -> int:
    return ((v + m - 1) // m) * m


def _tile_defaults() -> tuple[int, int, int]:
    """(tm, tn, tk) defaults per TPU generation (see roofline notes above)."""
    kind = ""
    try:
        kind = jax.devices()[0].device_kind.lower()
    except Exception:  # pragma: no cover - CPU/interpret fallback
        pass
    if "v5" in kind:
        return 512, 512, 1024
    if "v6" in kind:
        return 1024, 2048, 1024
    if "v7" in kind:
        return 512, 2048, 1024
    return 512, 1024, 1024


def _make_kernel(has_bias: bool, k_steps: int):
    """Builds the per-tile kernel. The weight tile is (tk, tn) (pre-transposed),
    so the contraction is MXU-canonical: (tm, tk) @ (tk, tn)."""
    if k_steps == 1:
        # No K reduction axis: no accumulator scratch, output written once.
        def kernel(*refs):
            if has_bias:
                x_ref, w_ref, b_ref, o_ref = refs
            else:
                x_ref, w_ref, o_ref = refs
                b_ref = None
            acc = jnp.dot(x_ref[...], w_ref[...],
                          preferred_element_type=jnp.float32)
            if has_bias:
                acc = acc + b_ref[...].astype(jnp.float32)
            o_ref[...] = acc.astype(o_ref.dtype)
        return kernel

    def kernel(*refs):
        if has_bias:
            x_ref, w_ref, b_ref, o_ref, acc_ref = refs
        else:
            x_ref, w_ref, o_ref, acc_ref = refs
            b_ref = None
        k = pl.program_id(2)

        @pl.when(k == 0)
        def _init():
            acc_ref[...] = jnp.zeros_like(acc_ref)

        acc_ref[...] += jnp.dot(x_ref[...], w_ref[...],
                                preferred_element_type=jnp.float32)

        @pl.when(k == pl.num_programs(2) - 1)
        def _finalize():
            out = acc_ref[...]
            if has_bias:
                out = out + b_ref[...].astype(jnp.float32)
            o_ref[...] = out.astype(o_ref.dtype)
    return kernel


class PallasLinear:
    """Layer-persistent form: transposes + pads the weight once at init,
    so the per-call hot path only pads activation rows (cheap)."""

    def __init__(self, weight: jax.Array, bias: jax.Array | None = None):
        self.out_features, self.in_features = weight.shape
        _, tn, tk = _tile_defaults()
        self.tn = min(tn, _round_up(self.out_features, 128))
        self.tk = min(tk, _round_up(self.in_features, 128))
        Kp = _round_up(self.in_features, self.tk)
        Np = _round_up(self.out_features, self.tn)

        # (N, K) -> (K, N): MXU-canonical RHS, done once (not per call).
        wt = weight.T
        if (Kp, Np) != wt.shape:
            wt = jnp.pad(wt, ((0, Kp - self.in_features),
                              (0, Np - self.out_features)))
        self.w_t = wt  # (Kp, Np)

        if bias is not None:
            b = bias.astype(jnp.float32)
            if Np != self.out_features:
                b = jnp.pad(b, (0, Np - self.out_features))
            self.bias = b.reshape(1, Np)
        else:
            self.bias = None

    def __call__(self, x: jax.Array) -> jax.Array:
        orig_shape = x.shape
        K, N = self.in_features, self.out_features
        assert orig_shape[-1] == K, (orig_shape, K)
        x2d = x.reshape(-1, K)
        M = x2d.shape[0]
        out_dtype = x.dtype
        in_bytes = jnp.dtype(x.dtype).itemsize
        out_bytes = jnp.dtype(out_dtype).itemsize

        tn, tk = self.tn, self.tk
        Kp, Np = self.w_t.shape

        # Row tile respects sublane packing (16 rows for bf16, 8 for f32).
        row_mult = 16 if x.dtype == jnp.bfloat16 else 8
        tm_default, _, _ = _tile_defaults()
        tm = min(tm_default, _round_up(M, row_mult))
        Mp = _round_up(M, tm)

        # Only the activation is padded per call; its zero K columns line up
        # with the prepared weight's zero K rows (exact for the dot product).
        if (Mp, Kp) != (M, K):
            x2d = jnp.pad(x2d, ((0, Mp - M), (0, Kp - K)))

        m_blocks, n_blocks, k_steps = Mp // tm, Np // tn, Kp // tk
        has_bias = self.bias is not None
        kernel = _make_kernel(has_bias, k_steps)

        if k_steps == 1:
            grid = (m_blocks, n_blocks)
            x_spec = pl.BlockSpec((tm, tk), lambda i, j: (i, 0))
            w_spec = pl.BlockSpec((tk, tn), lambda i, j: (0, j))
            b_spec = pl.BlockSpec((1, tn), lambda i, j: (0, j))
            o_spec = pl.BlockSpec((tm, tn), lambda i, j: (i, j))
            dims = ("parallel", "parallel")
            scratch = []
        else:
            grid = (m_blocks, n_blocks, k_steps)
            x_spec = pl.BlockSpec((tm, tk), lambda i, j, k: (i, k))
            w_spec = pl.BlockSpec((tk, tn), lambda i, j, k: (k, j))
            b_spec = pl.BlockSpec((1, tn), lambda i, j, k: (0, j))
            o_spec = pl.BlockSpec((tm, tn), lambda i, j, k: (i, j))
            dims = ("parallel", "parallel", "arbitrary")
            scratch = [pltpu.VMEM((tm, tn), jnp.float32)]

        in_specs = [x_spec, w_spec]
        inputs = [x2d, self.w_t]
        if has_bias:
            in_specs.append(b_spec)
            inputs.append(self.bias)

        # VMEM budget: double-buffered x/w/out tiles (+ bias) + f32 accumulator.
        vmem_needed = 2 * (tm * tk * in_bytes + tk * tn * in_bytes
                           + tm * tn * out_bytes)
        if has_bias:
            vmem_needed += 2 * tn * 4
        if k_steps > 1:
            vmem_needed += tm * tn * 4
        vmem_limit = int(min(max(vmem_needed * 3 // 2, 32 << 20), 96 << 20))

        cost = pl.CostEstimate(
            flops=2 * M * N * K,
            transcendentals=0,
            bytes_accessed=(M * K * in_bytes + K * N * in_bytes
                            + M * N * out_bytes + (N * 4 if has_bias else 0)),
        )

        out = pl.pallas_call(
            kernel,
            out_shape=jax.ShapeDtypeStruct((Mp, Np), out_dtype),
            grid_spec=pltpu.PrefetchScalarGridSpec(
                num_scalar_prefetch=0,
                grid=grid,
                in_specs=in_specs,
                out_specs=o_spec,
                scratch_shapes=scratch),
            compiler_params=pltpu.CompilerParams(
                dimension_semantics=dims,
                vmem_limit_bytes=vmem_limit),
            cost_estimate=cost,
        )(*inputs)

        if (Mp, Np) != (M, N):
            out = out[:M, :N]
        return out.reshape(*orig_shape[:-1], N)


def linear(x: jax.Array, weight: jax.Array,
           bias: jax.Array | None = None) -> jax.Array:
    """Functional form (module parity: y = x @ W^T + b with W = (out, in)).

    Note: this re-prepares (transposes/pads) the weight on every call; for a
    layer-persistent weight use PallasLinear so that cost is paid once.
    """
    return PallasLinear(weight, bias)(x)


if __name__ == "__main__":
    key = jax.random.PRNGKey(0)
    kx, kw, kb = jax.random.split(key, 3)

    # Small shapes consistent with the module: tokens = batch*seq, hidden dims.
    batch, seq, in_features, out_features = 2, 8, 32, 64

    x = jax.random.normal(
        kx, (batch, seq, in_features), dtype=jnp.float32).astype(jnp.bfloat16)
    weight = (0.05 * jax.random.normal(
        kw, (out_features, in_features), dtype=jnp.float32)).astype(jnp.bfloat16)

    # Module default: bias=False. Layer-persistent path (weight prepped once).
    layer = PallasLinear(weight)
    out = jax.block_until_ready(layer(x))

    ref = jnp.dot(x.astype(jnp.float32),
                  weight.astype(jnp.float32).T).astype(x.dtype)
    assert out.shape == ref.shape
    assert jnp.allclose(out.astype(jnp.float32), ref.astype(jnp.float32),
                        atol=2e-2, rtol=2e-2), "mismatch vs reference (no bias)"

    # Optional bias path (bias=True in the module), via the functional wrapper.
    bias = 0.1 * jax.random.normal(kb, (out_features,), dtype=jnp.float32)
    out_b = jax.block_until_ready(linear(x, weight, bias))
    ref_b = (jnp.dot(x.astype(jnp.float32), weight.astype(jnp.float32).T)
             + bias).astype(x.dtype)
    assert jnp.allclose(out_b.astype(jnp.float32), ref_b.astype(jnp.float32),
                        atol=2e-2, rtol=2e-2), "mismatch vs reference (bias)"

    print("KERNEL_OK")
</pallas_src>

<mosaic_0001>
module attributes {stable_mosaic.version = 11 : i64} {
  func.func @kernel(%arg0: i32, %arg1: i32, %arg2: memref<16x128xbf16, #tpu.memory_space<vmem>>, %arg3: memref<128x128xbf16, #tpu.memory_space<vmem>>, %arg4: memref<16x128xbf16, #tpu.memory_space<vmem>>) attributes {dimension_semantics = [#tpu.dimension_semantics<parallel>, #tpu.dimension_semantics<parallel>], iteration_bounds = array<i64: 1, 1>, scalar_prefetch = 0 : i64, scratch_operands = 0 : i64, tpu.core_type = #tpu.core_type<tc>, window_params = [{transform_indices = @transform_0, window_bounds = array<i64: 16, 128>}, {transform_indices = @transform_1, window_bounds = array<i64: 128, 128>}, {transform_indices = @transform_2, window_bounds = array<i64: 16, 128>}]} {
    %c0 = arith.constant 0 : index
    %c0_0 = arith.constant 0 : index
    %0 = vector.load %arg2[%c0, %c0_0] : memref<16x128xbf16, #tpu.memory_space<vmem>>, vector<16x128xbf16>
    %c0_1 = arith.constant 0 : index
    %c0_2 = arith.constant 0 : index
    %1 = vector.load %arg3[%c0_1, %c0_2] : memref<128x128xbf16, #tpu.memory_space<vmem>>, vector<128x128xbf16>
    %cst = arith.constant dense<0.000000e+00> : vector<16x128xf32>
    %2 = tpu.matmul %0, %1, %cst {dimension_numbers = #tpu.dot_dimension_numbers<[1], [0], [0], [1], [0, 0, 1, 1], [], []>} : vector<16x128xbf16>, vector<128x128xbf16>, vector<16x128xf32> -> vector<16x128xf32>
    %3 = arith.truncf %2 : vector<16x128xf32> to vector<16x128xbf16>
    %c0_3 = arith.constant 0 : index
    %c0_4 = arith.constant 0 : index
    %4 = vector.load %arg4[%c0_3, %c0_4] : memref<16x128xbf16, #tpu.memory_space<vmem>>, vector<16x128xbf16>
    tpu.vector_store %arg4[%c0_3, %c0_4], %3 {strides = array<i32>} : memref<16x128xbf16, #tpu.memory_space<vmem>>, vector<16x128xbf16>,
    return
  }
  func.func @transform_0(%arg0: i32, %arg1: i32) -> (i32, i32) {
    %c0_i32 = arith.constant 0 : i32
    %c0_i32_0 = arith.constant 0 : i32
    return %arg0, %c0_i32 : i32, i32
  }
  func.func @transform_1(%arg0: i32, %arg1: i32) -> (i32, i32) {
    %c0_i32 = arith.constant 0 : i32
    %c0_i32_0 = arith.constant 0 : i32
    return %c0_i32, %arg1 : i32, i32
  }
  func.func @transform_2(%arg0: i32, %arg1: i32) -> (i32, i32) {
    %c0_i32 = arith.constant 0 : i32
    return %arg0, %arg1 : i32, i32
  }
}

</mosaic_0001>

<bundles_post_ra>
// kernel: tpu_custom_call.1
= control target key start
LH: loop header
LB: loop body
LE: loop exit
PB: predicated region body
PF: predicated region fallthrough
CT: control target
= control target key end

     0   :  { %7 = vsyncpa [#allocation3], 0  ;;  %s351_s0 = inlined_call_operand.hbm [shape: bf16[16,128], index: 0, kind: input, shape index: {}]   ;;  %s352_s1 = inlined_call_operand.hbm [shape: bf16[128,128], index: 1, kind: input, shape index: {}]   ;;  %s353_s2 = inlined_call_operand.hbm [shape: bf16[16,128], index: 2, kind: output, shape index: {}]  }
   0x1   :  { %8 = vsyncpa [#allocation6], 0 }
   0x2   :  { %9 = vsyncpa [#allocation4], 0  ;;  %s311_s9 = smov [#allocation2]  }
   0x3   :  { %s15_s10 = sshll.u32 %s311_s9, 4  ;;  %s16_s10 = int_to_ptr.vmem [resolvable:$true] %s15_s10 }
   0x4   :  { %s253_s11 = scalar_lea.vmem %s16_s10, 128  ;;  %p258_p1 = scmp.lt.s32.totalorder %s16_s10, %s16_s10 }
   0x5   :  { %p254_p0 = scmp.ne.s32.totalorder %s16_s10, %s253_s11  ;;  %p259_p2 = scmp.lt.s32.totalorder %s253_s11, %s253_s11 }
   0x7   :  { %p260_p3 = por %p259_p2, %p258_p1 }
   0x9   :  { %p261_p4 = pnand %p260_p3, %p254_p0 }
   0xb   :  { %264 = shalt.err (!%p261_p4)
}
   0xc   :  { %s312_s12 = smov 64   ;;  %s313_s13 = smov 4  }
   0xd   :  { %21 = dma.hbm_to_vmem [thread:$0]  %s351_s0, 128, %s16_s10, [#allocation3], %s312_s12, %s312_s12, %s313_s13  }
   0xe   :  { %s314_s16 = smov [#allocation5]  }
   0xf   :  { %s27_s17 = sshll.u32 %s314_s16, 4  ;;  %s28_s17 = int_to_ptr.vmem [resolvable:$true] %s27_s17 }
  0x10   :  { %s273_s18 = scalar_lea.vmem %s28_s17, 1024  ;;  %p278_p6 = scmp.lt.s32.totalorder %s28_s17, %s28_s17 }
  0x11   :  { %p274_p5 = scmp.ne.s32.totalorder %s28_s17, %s273_s18  ;;  %p279_p7 = scmp.lt.s32.totalorder %s273_s18, %s273_s18 }
  0x13   :  { %p280_p8 = por %p279_p7, %p278_p6 }
  0x15   :  { %p281_p9 = pnand %p280_p8, %p274_p5 }
  0x17   :  { %284 = shalt.err (!%p281_p9)
}
  0x18   :  { %33 = dma.hbm_to_vmem [thread:$0]  %s352_s1, 1024, %s28_s17, [#allocation6], %s312_s12, %s312_s12, %s313_s13  }
  0x19   :  { %305 = dma.done.wait [#allocation3], 128  }
  0x1a   :  { %306 = vsyncadd [#allocation3], 4294967168 }
  0x1b   :  { %307 = dma.done.wait [#allocation6], 1024  }
  0x1c   :  { %308 = vsyncadd [#allocation6], 4294966272  ;;  %v315_v0 = vmov 0.0   ;;  %vm316_vm0 = vmmov 0   ;;  %v236_v1 = vld [vmem:[#allocation5 + $0x38] sm:$0xff]   ;;  %v237_v2 = vld [vmem:[#allocation5 + $0x30] sm:$0xff]  }
  0x1d   :  { %209 = vmatprep.subr.bf16.mxu0 %v315_v0  ;;  %225 = vmatprep.mubr.msk.bf16.mxu0 %vm316_vm0, %v315_v0  ;;  %v238_v3 = vld [vmem:[#allocation5 + $0x28] sm:$0xff]   ;;  %v239_v4 = vld [vmem:[#allocation5 + $0x20] sm:$0xff]   ;;  %v240_v5 = vld [vmem:[#allocation5 + $0x18] sm:$0xff]   ;;  %s317_s0 = smov [#allocation7]  }
  0x1e   :  { %210 = vmatpush3.bf16.msra.mxu0 %v236_v1  ;;  %v241_v6 = vld [vmem:[#allocation5 + $0x10] sm:$0xff]   ;;  %v242_v7 = vld [vmem:[#allocation5 + $0x8] sm:$0xff]   ;;  %v243_v8 = vld [vmem:[#allocation5] sm:$0xff]   ;;  %s169_s1 = sshll.u32 %s317_s0, 4  ;;  %s170_s1 = int_to_ptr.vmem [resolvable:$true] %s169_s1 }
  0x1f   :  { %211 = vmatprep.subr.bf16.mxu0 %v315_v0  ;;  %v244_v9 = vld [vmem:[#allocation2] sm:$0xff]   ;;  %s285_s21 = scalar_lea.vmem %s170_s1, 128  ;;  %p290_p11 = scmp.lt.s32.totalorder %s170_s1, %s170_s1 }
  0x20   :  { %p286_p10 = scmp.ne.s32.totalorder %s170_s1, %s285_s21  ;;  %p291_p12 = scmp.lt.s32.totalorder %s285_s21, %s285_s21 }
  0x22   :  { %212 = vmatpush3.bf16.msra.mxu0 %v237_v2  ;;  %p292_p13 = por %p291_p12, %p290_p11 }
  0x23   :  { %213 = vmatprep.subr.bf16.mxu0 %v315_v0 }
  0x24   :  { %p293_p0 = pnand %p292_p13, %p286_p10 }
  0x26   :  { %214 = vmatpush3.bf16.msra.mxu0 %v238_v3 }
  0x27   :  { %215 = vmatprep.subr.bf16.mxu0 %v315_v0 }
  0x2a   :  { %216 = vmatpush3.bf16.msra.mxu0 %v239_v4 }
  0x2b   :  { %217 = vmatprep.subr.bf16.mxu0 %v315_v0 }
  0x2e   :  { %218 = vmatpush3.bf16.msra.mxu0 %v240_v5 }
  0x2f   :  { %219 = vmatprep.subr.bf16.mxu0 %v315_v0 }
  0x32   :  { %220 = vmatpush3.bf16.msra.mxu0 %v241_v6 }
  0x33   :  { %221 = vmatprep.subr.bf16.mxu0 %v315_v0 }
  0x36   :  { %222 = vmatpush3.bf16.msra.mxu0 %v242_v7 }
  0x37   :  { %223 = vmatprep.subr.bf16.mxu0 %v315_v0 }
  0x3a   :  { %224 = vmatpush3.bf16.msra.mxu0 %v243_v8 }
  0x3d   :  { %226 = vmatmul.mubr.bf16.vlgmr.msra.gmra.mxu0 %v244_v9 }
  0xfd   :  { %v147_v10 = vpop.f32.mrf.mxu0 }
  0xff   :  { %v227_v11 = vpop.f32.mrf.mxu0 }
 0x101   :  { %v150_v12 = vpop.f32.mrf.mxu0 }
 0x102   :  { %v198_v13 = vpack.c.bf16 %v150_v12, %v147_v10 }
 0x103   :  { %v228_v14 = vpop.f32.mrf.mxu0 }
 0x104   :  { %199 = vst [vmem:[#allocation7] sm:$0xff] %v198_v13  }
 0x105   :  { %296 = shalt.err (!%p293_p0)
}
 0x106   :  { %175 = dma.vmem_to_hbm [thread:$0]  %s170_s1, 128, %s353_s2, [#allocation4], %s312_s12, %s312_s12, %s313_s13  }
 0x107   :  { %309 = dma.done.wait [#allocation4], 128  }
 0x108   :  { %310 = vsyncadd [#allocation4], 4294967168 }
 0x109   :  { %179 = vsyncpa [#allocation3], 1 }
 0x10a   :  { %180 = vsyncpa [#allocation6], 1 }
 0x10b   :  { %181 = vsyncpa [#allocation4], 1 }

</bundles_post_ra>
